<compile_context>
chip_gen: v7x
topology: tpu7x:2x2x1
jax: 0.10.0
libtpu: 0.0.40
codegen_flags: <defaults>
</compile_context>

<pallas_src>
import functools
import math

import jax
import jax.numpy as jnp
from jax.experimental import pallas as pl
from jax.experimental.pallas import tpu as pltpu


_SQRT_2_OVER_PI = math.sqrt(2.0 / math.pi)


def _gelu_tanh(x):
    # tanh-approximate GELU (== torch nn.GELU(approximate='tanh')).
    # TODO(synk): torch's default nn.GELU() is erf-exact; Mosaic has no erf
    # lowering, so the tanh approximation (max abs deviation ~1e-3) is used
    # both here and in the pure-JAX reference. tanh runs on the EUP slot, so
    # it overlaps with VPU/MXU work.
    return 0.5 * x * (1.0 + jnp.tanh(_SQRT_2_OVER_PI * (x + 0.044715 * x * x * x)))


# -----------------------------------------------------------------------------
# Fused FeedForward kernel: one row-tile per grid step.
#   x_ref : (tm, D) f32      w1_ref : (D, H) compute_dtype     b1_ref : (1, H) f32
#   w2_ref: (H, D) compute_dtype                               b2_ref : (1, D) f32
#   o_ref : (tm, D) f32
# -----------------------------------------------------------------------------
def _ff_kernel(compute_dtype, x_ref, w1_ref, b1_ref, w2_ref, b2_ref, o_ref):
    x = x_ref[...]
    # Linear(dim -> hidden) on the MXU, f32 accumulation.
    h = jnp.dot(x.astype(compute_dtype), w1_ref[...],
                preferred_element_type=jnp.float32) + b1_ref[...]
    # GELU in f32 (VPU + EUP). Hidden activation never leaves VMEM/vregs.
    h = _gelu_tanh(h)
    # Linear(hidden -> dim) on the MXU, f32 accumulation.
    y = jnp.dot(h.astype(compute_dtype), w2_ref[...],
                preferred_element_type=jnp.float32) + b2_ref[...]
    # Dropout(p=0.0) is identity in the forward pass.
    o_ref[...] = y.astype(o_ref.dtype)


def _pick_row_tile(M, tm_max):
    """Sublane-aligned row tile, capped so the grid has >=2 parallel steps."""
    half = 8 * max(1, (M // 2) // 8)     # largest multiple of 8 <= M/2
    return max(8, min(tm_max, half))


def feedforward_pallas(x, params, *, compute_dtype=jnp.bfloat16, tm_max=256):
    """FeedForward forward: x @ W1.T + b1 -> GELU -> @ W2.T + b2.

    x: (..., D) float32.
    params: {"w1": (H, D), "b1": (H,), "w2": (D, H), "b2": (D,)}  (torch Linear layout).
    """
    orig_shape = x.shape
    D = orig_shape[-1]
    H = params["w1"].shape[0]

    x2 = x.reshape(-1, D).astype(jnp.float32)
    M = x2.shape[0]

    tm = _pick_row_tile(M, tm_max)
    Mp = pl.cdiv(M, tm) * tm
    if Mp != M:
        x2 = jnp.pad(x2, ((0, Mp - M), (0, 0)))
    grid = (Mp // tm,)

    # Weights transposed once at trace time and cast to the MXU compute dtype;
    # biases stay f32 (row vectors broadcast against the row tile in-kernel).
    w1t = params["w1"].T.astype(compute_dtype)          # (D, H)
    w2t = params["w2"].T.astype(compute_dtype)          # (H, D)
    b1 = params["b1"].reshape(1, H).astype(jnp.float32)
    b2 = params["b2"].reshape(1, D).astype(jnp.float32)

    wbytes = 2 * D * H * jnp.dtype(compute_dtype).itemsize
    cost = pl.CostEstimate(
        flops=4 * Mp * D * H,            # two (Mp, D, H) matmuls
        transcendentals=Mp * H,          # one tanh per hidden element
        bytes_accessed=8 * Mp * D + wbytes + 4 * (D + H),
    )

    out = pl.pallas_call(
        functools.partial(_ff_kernel, compute_dtype),
        out_shape=jax.ShapeDtypeStruct((Mp, D), jnp.float32),
        grid=grid,
        in_specs=[
            pl.BlockSpec((tm, D), lambda i: (i, 0)),   # x row tile (pipelined)
            pl.BlockSpec((D, H), lambda i: (0, 0)),    # W1^T (VMEM-resident)
            pl.BlockSpec((1, H), lambda i: (0, 0)),    # b1
            pl.BlockSpec((H, D), lambda i: (0, 0)),    # W2^T (VMEM-resident)
            pl.BlockSpec((1, D), lambda i: (0, 0)),    # b2
        ],
        out_specs=pl.BlockSpec((tm, D), lambda i: (i, 0)),
        compiler_params=pltpu.CompilerParams(
            dimension_semantics=("parallel",),
        ),
        cost_estimate=cost,
    )(x2, w1t, b1, w2t, b2)

    if Mp != M:
        out = out[:M]
    return out.reshape(orig_shape)


# -----------------------------------------------------------------------------
# Pure-JAX reference (mirrors the PyTorch forward; dropout p=0 is identity)
# -----------------------------------------------------------------------------
def feedforward_reference(x, params):
    h = jnp.einsum("...d,hd->...h", x, params["w1"]) + params["b1"]
    h = _gelu_tanh(h)
    return jnp.einsum("...h,dh->...d", h, params["w2"]) + params["b2"]


# -----------------------------------------------------------------------------
if __name__ == "__main__":
    # FeedForward(dim=128, hidden_dim=256) applied to tokens of shape
    # (batch=2, seq=8, dim=128) — small but lane-friendly (multiples of 128).
    B, S, D, H = 2, 8, 128, 256
    f32 = jnp.float32

    key = jax.random.PRNGKey(0)
    k = jax.random.split(key, 5)
    params = {
        "w1": (1.0 / math.sqrt(D)) * jax.random.normal(k[0], (H, D), f32),
        "b1": 0.05 * jax.random.normal(k[1], (H,), f32),
        "w2": (1.0 / math.sqrt(H)) * jax.random.normal(k[2], (D, H), f32),
        "b2": 0.05 * jax.random.normal(k[3], (D,), f32),
    }
    x = jax.random.normal(k[4], (B, S, D), f32)

    # f32 matmul path (exactness check) and bf16 matmul path (perf path).
    out_f32 = jax.block_until_ready(
        feedforward_pallas(x, params, compute_dtype=jnp.float32))
    out_bf16 = jax.block_until_ready(
        feedforward_pallas(x, params, compute_dtype=jnp.bfloat16))

    assert out_f32.shape == (B, S, D)
    assert out_bf16.shape == (B, S, D)

    ref = feedforward_reference(x, params)
    err32 = float(jnp.max(jnp.abs(out_f32 - ref)))
    errbf = float(jnp.max(jnp.abs(out_bf16 - ref)))
    assert jnp.allclose(out_f32, ref, atol=1e-3, rtol=1e-3), err32
    assert jnp.allclose(out_bf16, ref, atol=5e-2, rtol=5e-2), errbf

    print("KERNEL_OK")
</pallas_src>

<mosaic_0001>
module attributes {stable_mosaic.version = 11 : i64} {
  func.func @_ff_kernel(%arg0: i32, %arg1: memref<8x128xf32, #tpu.memory_space<vmem>>, %arg2: memref<128x256xf32, #tpu.memory_space<vmem>>, %arg3: memref<1x256xf32, #tpu.memory_space<vmem>>, %arg4: memref<256x128xf32, #tpu.memory_space<vmem>>, %arg5: memref<1x128xf32, #tpu.memory_space<vmem>>, %arg6: memref<8x128xf32, #tpu.memory_space<vmem>>) attributes {dimension_semantics = [#tpu.dimension_semantics<parallel>], iteration_bounds = array<i64: 2>, scalar_prefetch = 0 : i64, scratch_operands = 0 : i64, tpu.core_type = #tpu.core_type<tc>, window_params = [{transform_indices = @transform_0, window_bounds = array<i64: 8, 128>}, {pipeline_mode = #tpu.pipeline_mode<synchronous>, transform_indices = @transform_1, window_bounds = array<i64: 128, 256>}, {pipeline_mode = #tpu.pipeline_mode<synchronous>, transform_indices = @transform_2, window_bounds = array<i64: 1, 256>}, {pipeline_mode = #tpu.pipeline_mode<synchronous>, transform_indices = @transform_3, window_bounds = array<i64: 256, 128>}, {pipeline_mode = #tpu.pipeline_mode<synchronous>, transform_indices = @transform_4, window_bounds = array<i64: 1, 128>}, {transform_indices = @transform_5, window_bounds = array<i64: 8, 128>}]} {
    %c0 = arith.constant 0 : index
    %c0_0 = arith.constant 0 : index
    %0 = vector.load %arg1[%c0, %c0_0] : memref<8x128xf32, #tpu.memory_space<vmem>>, vector<8x128xf32>
    %c0_1 = arith.constant 0 : index
    %c0_2 = arith.constant 0 : index
    %1 = vector.load %arg2[%c0_1, %c0_2] : memref<128x256xf32, #tpu.memory_space<vmem>>, vector<128x256xf32>
    %cst = arith.constant dense<0.000000e+00> : vector<8x256xf32>
    %2 = tpu.matmul %0, %1, %cst {dimension_numbers = #tpu.dot_dimension_numbers<[1], [0], [0], [1], [0, 0, 1, 1], [], []>} : vector<8x128xf32>, vector<128x256xf32>, vector<8x256xf32> -> vector<8x256xf32>
    %c0_3 = arith.constant 0 : index
    %c0_4 = arith.constant 0 : index
    %3 = vector.load %arg3[%c0_3, %c0_4] : memref<1x256xf32, #tpu.memory_space<vmem>>, vector<1x256xf32>
    %4 = vector.broadcast %3 : vector<1x256xf32> to vector<8x256xf32>
    %5 = arith.addf %2, %4 : vector<8x256xf32>
    %cst_5 = arith.constant 5.000000e-01 : f32
    %6 = vector.broadcast %cst_5 : f32 to vector<8x256xf32>
    %7 = arith.mulf %6, %5 : vector<8x256xf32>
    %cst_6 = arith.constant 4.471500e-02 : f32
    %8 = vector.broadcast %cst_6 : f32 to vector<8x256xf32>
    %9 = arith.mulf %8, %5 : vector<8x256xf32>
    %10 = arith.mulf %9, %5 : vector<8x256xf32>
    %11 = arith.mulf %10, %5 : vector<8x256xf32>
    %12 = arith.addf %5, %11 : vector<8x256xf32>
    %cst_7 = arith.constant 0.797884583 : f32
    %13 = vector.broadcast %cst_7 : f32 to vector<8x256xf32>
    %14 = arith.mulf %13, %12 : vector<8x256xf32>
    %15 = math.tanh %14 : vector<8x256xf32>
    %cst_8 = arith.constant 1.000000e+00 : f32
    %16 = vector.broadcast %cst_8 : f32 to vector<8x256xf32>
    %17 = arith.addf %16, %15 : vector<8x256xf32>
    %18 = arith.mulf %7, %17 : vector<8x256xf32>
    %c0_9 = arith.constant 0 : index
    %c0_10 = arith.constant 0 : index
    %19 = vector.load %arg4[%c0_9, %c0_10] : memref<256x128xf32, #tpu.memory_space<vmem>>, vector<256x128xf32>
    %cst_11 = arith.constant dense<0.000000e+00> : vector<8x128xf32>
    %20 = tpu.matmul %18, %19, %cst_11 {dimension_numbers = #tpu.dot_dimension_numbers<[1], [0], [0], [1], [0, 0, 1, 1], [], []>} : vector<8x256xf32>, vector<256x128xf32>, vector<8x128xf32> -> vector<8x128xf32>
    %c0_12 = arith.constant 0 : index
    %c0_13 = arith.constant 0 : index
    %21 = vector.load %arg5[%c0_12, %c0_13] : memref<1x128xf32, #tpu.memory_space<vmem>>, vector<1x128xf32>
    %22 = vector.broadcast %21 : vector<1x128xf32> to vector<8x128xf32>
    %23 = arith.addf %20, %22 : vector<8x128xf32>
    %c0_14 = arith.constant 0 : index
    %c0_15 = arith.constant 0 : index
    %24 = vector.load %arg6[%c0_14, %c0_15] : memref<8x128xf32, #tpu.memory_space<vmem>>, vector<8x128xf32>
    tpu.vector_store %arg6[%c0_14, %c0_15], %23 {strides = array<i32>} : memref<8x128xf32, #tpu.memory_space<vmem>>, vector<8x128xf32>,
    return
  }
  func.func @transform_0(%arg0: i32) -> (i32, i32) {
    %c0_i32 = arith.constant 0 : i32
    %c0_i32_0 = arith.constant 0 : i32
    return %arg0, %c0_i32 : i32, i32
  }
  func.func @transform_1(%arg0: i32) -> (i32, i32) {
    %c0_i32 = arith.constant 0 : i32
    %c0_i32_0 = arith.constant 0 : i32
    %c0_i32_1 = arith.constant 0 : i32
    return %c0_i32, %c0_i32_0 : i32, i32
  }
  func.func @transform_2(%arg0: i32) -> (i32, i32) {
    %c0_i32 = arith.constant 0 : i32
    %c0_i32_0 = arith.constant 0 : i32
    %c0_i32_1 = arith.constant 0 : i32
    return %c0_i32, %c0_i32_0 : i32, i32
  }
  func.func @transform_3(%arg0: i32) -> (i32, i32) {
    %c0_i32 = arith.constant 0 : i32
    %c0_i32_0 = arith.constant 0 : i32
    %c0_i32_1 = arith.constant 0 : i32
    return %c0_i32, %c0_i32_0 : i32, i32
  }
  func.func @transform_4(%arg0: i32) -> (i32, i32) {
    %c0_i32 = arith.constant 0 : i32
    %c0_i32_0 = arith.constant 0 : i32
    %c0_i32_1 = arith.constant 0 : i32
    return %c0_i32, %c0_i32_0 : i32, i32
  }
  func.func @transform_5(%arg0: i32) -> (i32, i32) {
    %c0_i32 = arith.constant 0 : i32
    %c0_i32_0 = arith.constant 0 : i32
    return %arg0, %c0_i32 : i32, i32
  }
}

</mosaic_0001>

<bundles_post_ra>
// kernel: tpu_custom_call.1
= control target key start
LH: loop header
LB: loop body
LE: loop exit
PB: predicated region body
PF: predicated region fallthrough
CT: control target
= control target key end

     0   :  { %10 = vsyncpa [#allocation3], 0  ;;  %s1247_s0 = inlined_call_operand.hbm [shape: f32[16,128], index: 0, kind: input, shape index: {}]   ;;  %s1248_s1 = inlined_call_operand.hbm [shape: f32[128,256], index: 1, kind: input, shape index: {}]   ;;  %s1249_s2 = inlined_call_operand.vmem [shape: f32[1,256], index: 2, kind: input, shape index: {}]   ;;  %s1250_s3 = inlined_call_operand.hbm [shape: f32[256,128], index: 3, kind: input, shape index: {}]   ;;  %s1251_s4 = inlined_call_operand.vmem [shape: f32[1,128], index: 4, kind: input, shape index: {}]   ;;  %s1252_s5 = inlined_call_operand.hbm [shape: f32[16,128], index: 5, kind: output, shape index: {}]  }
   0x1   :  { %12 = vsyncpa [#allocation3 + $0x1], 0 }
   0x2   :  { %13 = vsyncpa [#allocation6], 0 }
   0x3   :  { %14 = vsyncpa [#allocation4], 0 }
   0x4   :  { %16 = vsyncpa [#allocation4 + $0x1], 0  ;;  %s1005_s18 = smov 0   ;;  %s1007_s19 = smov 0  }
   0x5   :  { %s1009_s20 = smov 0   ;;  %s1011_s21 = smov 0  }
   0x6 LB: > { %s1026_s22 = sadd.s32 4294967295, %s964_s21   ;;  %s616_s23 = sadd.s32 4294967294, %s964_s21   ;;  %s964_s21 = sphi %s1011_s21, %s1272_s21   ;;  %s960_s20 = sphi %s1009_s20, %s1271_s20   ;;  %s956_s19 = sphi %s1007_s19, %s1270_s19   ;;  %s952_s18 = sphi %s1005_s18, %s1269_s18  }
   0x7   : > { %p42_p0 = scmp.ne.s32.totalorder %s956_s19, %s952_s18  ;;  %p1253_p1 = scmp.eq.s32.totalorder %s1026_s22, 0 }
   0x8   : > { %p156_p3 = scmp.eq.s32.totalorder %s616_s23, 1  ;;  %p617_p5 = scmp.ge.s32.totalorder %s964_s21, 1 }
   0x9   : > { %p1035_p4 = por %p1253_p1, %p42_p0  ;;  %p163_p7 = scmp.lt.s32.totalorder %s964_s21, 3 }
   0xa   : > { %p1040_p6 = por %p156_p3, %p42_p0  ;;  %s966_s27 = smov [#allocation5]  }
   0xb   : > { %s1256_s24 = scalar_select %p1035_p4, 1, 0 }
   0xc   : > { %s1257_s25 = scalar_select %p1040_p6, 1, 0 }
   0xd   : > { %p1045_p8 = pnand %p617_p5, %p163_p7  ;;  %s175_s28 = sshll.u32 %s966_s27, 4  ;;  %s1049_s28 = int_to_ptr.vmem [resolvable:$true] %s175_s28 }
   0xe   : > { %s967_s30 = smov [#allocation7]   ;;  %s808_s9 = scalar_lea.hbm %s1248_s1, 4096 }
   0xf   : > { %p744_p9 = pneg %p1045_p8  ;;  %s191_s6 = sshll.u32 %s967_s30, 4  ;;  %s1060_s6 = int_to_ptr.vmem [resolvable:$true] %s191_s6 }
  0x10   : > { %p809_p12 = scmp.ne.s32.totalorder %s1248_s1, %s808_s9  ;;  %p815_p5 = scmp.lt.u32.totalorder %s808_s9, %s1248_s1 }
  0x11   : > { %p1056_p11 = pnand %p744_p9, %p1253_p1 }
  0x13   : > { %p810_p13 = pneg %p1056_p11 }
  0x15   : > { %p811_p0 = pnand %p810_p13, %p809_p12 }
  0x17   : > { %p812_p3 = pneg %p811_p0 }
  0x19   : > { %p817_p7 = pnand %p815_p5, %p812_p3 }
  0x1b   : > { %820 = shalt.err (!%p817_p7)
}
  0x1c   : > { %s821_s14 = scalar_lea.vmem %s1049_s28, 4096  ;;  %p829_p2 = scmp.lt.s32.totalorder %s1049_s28, %s1049_s28 }
  0x1d   : > { %p822_p9 = scmp.ne.s32.totalorder %s1049_s28, %s821_s14  ;;  %p830_p12 = scmp.lt.s32.totalorder %s821_s14, %s821_s14 }
  0x1f   : > { %p824_p10 = pnand %p822_p9, %p810_p13  ;;  %p831_p0 = por %p830_p12, %p829_p2 }
  0x21   : > { %p825_p1 = pneg %p824_p10 }
  0x23   : > { %p832_p6 = pnand %p831_p0, %p825_p1 }
  0x25   : > { %835 = shalt.err (!%p832_p6)
}
  0x26   : > { %s968_s15 = smov 256   ;;  %s969_s16 = smov 16  }
  0x27   : > { %747 = dma.hbm_to_vmem [thread:$0]  (!%p1056_p11), %s1248_s1, 4096, %s1049_s28, [#allocation6], %s968_s15, %s968_s15, %s969_s16  }
  0x28   : > { %s836_s7 = scalar_lea.hbm %s1250_s3, 4096 }
  0x29   : > { %p837_p2 = scmp.ne.s32.totalorder %s1250_s3, %s836_s7  ;;  %p843_p10 = scmp.lt.u32.totalorder %s836_s7, %s1250_s3 }
  0x2b   : > { %p839_p1 = pnand %p837_p2, %p810_p13 }
  0x2d   : > { %p840_p6 = pneg %p839_p1 }
  0x2f   : > { %p845_p3 = pnand %p843_p10, %p840_p6 }
  0x31   : > { %848 = shalt.err (!%p845_p3)
}
  0x32   : > { %s849_s28 = scalar_lea.vmem %s1060_s6, 4096  ;;  %p857_p12 = scmp.lt.s32.totalorder %s1060_s6, %s1060_s6 }
  0x33   : > { %p850_p5 = scmp.ne.s32.totalorder %s1060_s6, %s849_s28  ;;  %p858_p0 = scmp.lt.s32.totalorder %s849_s28, %s849_s28 }
  0x35   : > { %p852_p7 = pnand %p850_p5, %p810_p13  ;;  %p859_p2 = por %p858_p0, %p857_p12 }
  0x37   : > { %p853_p9 = pneg %p852_p7 }
  0x39   : > { %p860_p1 = pnand %p859_p2, %p853_p9 }
  0x3b   : > { %863 = shalt.err (!%p860_p1)
}
  0x3c   : > { %s970_s12 = smov 128   ;;  %s971_s13 = smov 8  }
  0x3d   : > { %750 = dma.hbm_to_vmem [thread:$0]  (!%p1056_p11), %s1250_s3, 4096, %s1060_s6, [#allocation6], %s970_s12, %s970_s12, %s971_s13  }
  0x3e   : > { %s1115_s16 = sadd.s32 1, %s964_s21   ;;  %s29_s23 = sadd.s32 1, %s960_s20 }
  0x3f   : > { %s26_s17 = ssub.s32 %s964_s21, %s1115_s16  ;;  %p36_p6 = scmp.ne.s32.totalorder %s960_s20, %s956_s19 }
  0x40   : > { %p27_p13 = scmp.eq.s32.totalorder %s26_s17, 0  ;;  %p37_p10 = scmp.eq.s32.totalorder %s964_s21, 0 }
  0x41   : > { %p1260_p5 = scmp.eq.s32.totalorder %s1026_s22, 1  ;;  %p761_p9 = scmp.lt.s32.totalorder %s964_s21, 2 }
  0x42   : > { %s1124_s27 = scalar_select %p27_p13, %s960_s20, %s29_s23  }
  0x43   : > { %p38_p3 = por %p37_p10, %p36_p6  ;;  %p1128_p7 = por %p1260_p5, %p36_p6 }
  0x44   : > { %s208_s29 = sand.u32 1, %s960_s20   ;;  %s622_s6 = sshll.u32 %s964_s21, 7 }
  0x45   : > { %s1261_s30 = scalar_select %p1128_p7, 1, 0 }
  0x46   : > { %s621_s7 = sshll.u32 %s208_s29, 3  ;;  %s1138_s10 = scalar_lea.hbm %s1247_s0, %s622_s6 }
  0x47   : > { %s212_s11 = scalar_lea.vmem [#allocation2], %s621_s7  ;;  %p1142_p11 = pnand %p761_p9, %p38_p3 }
  0x48   : > { %s219_s28 = sshll.u32 %s212_s11, 4  ;;  %s209_s13 = scalar_lea.sflag [#allocation3], %s208_s29  ;;  %s1140_s28 = int_to_ptr.vmem [resolvable:$true] %s219_s28 }
  0x49   : > { %s864_s14 = scalar_lea.hbm %s1138_s10, 128  ;;  %p866_p0 = pneg %p1142_p11 }
  0x4a   : > { %p865_p12 = scmp.ne.s32.totalorder %s1138_s10, %s864_s14  ;;  %s869_s23 = scalar_lea.hbm %s1247_s0, 256 }
  0x4b   : > { %p870_p13 = scmp.lt.u32.totalorder %s1138_s10, %s1247_s0  ;;  %p871_p6 = scmp.lt.u32.totalorder %s869_s23, %s864_s14 }
  0x4c   : > { %p867_p2 = pnand %p866_p0, %p865_p12  ;;  %p873_p3 = scmp.lt.u32.totalorder %s864_s14, %s1138_s10 }
  0x4d   : > { %p872_p10 = por %p871_p6, %p870_p13 }
  0x4e   : > { %p868_p1 = pneg %p867_p2 }
  0x4f   : > { %p874_p5 = por %p873_p3, %p872_p10 }
  0x51   : > { %p875_p9 = pnand %p874_p5, %p868_p1 }
  0x53   : > { %878 = shalt.err (!%p875_p9)
}
  0x54   : > { %s879_s29 = scalar_lea.vmem %s1140_s28, 128  ;;  %s972_s8 = smov [#allocation2]  }
  0x55   : > { %p880_p12 = scmp.ne.s32.totalorder %s1140_s28, %s879_s29  ;;  %s884_s9 = sshll.u32 %s972_s8, 4  ;;  %s885_s9 = int_to_ptr.vmem [resolvable:$false] %s884_s9 }
  0x56   : > { %s886_s11 = scalar_lea.vmem %s885_s9, 256  ;;  %p887_p4 = scmp.lt.s32.totalorder %s1140_s28, %s885_s9 }
  0x57   : > { %p882_p2 = pnand %p880_p12, %p866_p0  ;;  %p888_p13 = scmp.lt.s32.totalorder %s886_s11, %s879_s29 }
  0x59   : > { %p883_p7 = pneg %p882_p2  ;;  %p889_p6 = por %p888_p13, %p887_p4 }
  0x5b   : > { %p890_p10 = pnand %p889_p6, %p883_p7 }
  0x5d   : > { %893 = shalt.err (!%p890_p10)
}
  0x5e   : > { %754 = dma.hbm_to_vmem [thread:$0]  (!%p1142_p11), %s1138_s10, 128, %s1140_s28, %s209_s13  }
  0x5f   : > { %228 = sbr.rel (%p1045_p8) target bundleno = 613 (0x265), region = 40  ;;  %s1174_s14 = sand.u32 (!%p1045_p8), 1, %s956_s19  }
  0x60   : > { %s624_s15 = sshll.u32 (!%p1045_p8), %s1174_s14, 3  ;;  %s231_s17 = scalar_lea.sflag (!%p1045_p8), [#allocation3], %s1174_s14 }
  0x61   : > { %s1180_s23 = scalar_lea.vmem (!%p1045_p8), [#allocation2], %s624_s15  ;;  %p1263_p4 = scmp.ne.s32.totalorder (!%p1045_p8), %s1256_s24, 0 }
  0x66   : > { %939 = dma.done.wait (%p1263_p4), %s231_s17, 128  }
  0x67   : > { %941 = vsyncadd (%p1263_p4), %s231_s17, 4294967168  ;;  %p1264_p7 = scmp.eq.s32.totalorder %s1026_s22, 0 }
  0x69   : > { %943 = dma.done.wait (%p1264_p7), [#allocation6], 8192   ;;  %p1265_p8 = pmov %p1264_p7 }
  0x6a   : > { %v973_v0 = vmov 0.0   ;;  %v271_v1 = vld [vmem:[#allocation5 + $0x8] sm:$0xff]  ;;  %v273_v2 = vld [vmem:[#allocation5 + $0x18] sm:$0xff]  ;;  %v270_v3 = vld [vmem:[#allocation5] sm:$0xff]  ;;  %s630_s12 = sshll.u32 %s1026_s22, 7  ;;  %s268_s13 = scalar_lea.vmem [#allocation8], %s624_s15 }
  0x6b   : > { %945 = vsyncadd (%p1265_p8), [#allocation6], 4294959104  ;;  %378 = vmatprep.mubr.f32.mxu0 %v973_v0  ;;  %v668_v4 = vpack.c.bf16 %v273_v2, %v271_v1  ;;  %v272_v5 = vld [vmem:[#allocation5 + $0x10] sm:$0xff]  ;;  %v275_v6 = vld [vmem:[#allocation5 + $0x28] sm:$0xff]  ;;  %s527_s7 = sshll.u32 %s268_s13, 4  ;;  %s1203_s8 = scalar_lea.hbm %s1252_s5, %s630_s12  ;;  %s1205_s7 = int_to_ptr.vmem [resolvable:$true] %s527_s7 }
  0x6c   : > { %v277_v7 = vld [vmem:[#allocation5 + $0x38] sm:$0xff]  ;;  %v670_v8 = vpack.c.bf16 %v272_v5, %v270_v3  ;;  %v274_v10 = vld [vmem:[#allocation5 + $0x20] sm:$0xff]  ;;  %v276_v11 = vld [vmem:[#allocation5 + $0x30] sm:$0xff]  ;;  %s514_s9 = scalar_lea.sflag [#allocation4], %s1174_s14  ;;  %s894_s11 = scalar_lea.vmem %s1205_s7, 128 }
  0x6d   : > { %v672_v9 = vpack.c.bf16 %v277_v7, %v275_v6  ;;  %v279_v12 = vld [vmem:[#allocation5 + $0x48] sm:$0xff]  ;;  %669 = vmatprep.subr.bf16.mxu0 %v668_v4  ;;  %v281_v13 = vld [vmem:[#allocation5 + $0x58] sm:$0xff]  ;;  %v674_v14 = vpack.c.bf16 %v276_v11, %v274_v10  ;;  %v278_v16 = vld [vmem:[#allocation5 + $0x40] sm:$0xff]  ;;  %p895_p11 = scmp.ne.s32.totalorder %s1205_s7, %s894_s11  ;;  %p1266_p0 = scmp.ne.s32.totalorder %s1261_s30, 0 }
  0x6e   : > { %671 = vmatpush1.bf16.msra.mxu0 %v670_v8  ;;  %v676_v15 = vpack.c.bf16 %v281_v13, %v279_v12  ;;  %v280_v17 = vld [vmem:[#allocation5 + $0x50] sm:$0xff]  ;;  %v283_v18 = vld [vmem:[#allocation5 + $0x68] sm:$0xff]  ;;  %v285_v19 = vld [vmem:[#allocation5 + $0x78] sm:$0xff]  ;;  %s974_s22 = smov [#allocation8]  }
  0x6f   : > { %673 = vmatprep.subr.bf16.mxu0 %v672_v9  ;;  %v678_v20 = vpack.c.bf16 %v280_v17, %v278_v16  ;;  %v680_v21 = vpack.c.bf16 %v285_v19, %v283_v18  ;;  %v282_v22 = vld [vmem:[#allocation5 + $0x60] sm:$0xff]  ;;  %v284_v23 = vld [vmem:[#allocation5 + $0x70] sm:$0xff]  ;;  %v287_v24 = vld [vmem:[#allocation5 + $0x88] sm:$0xff]  ;;  %p896_p1 = pnand %p895_p11, %p1266_p0  ;;  %s898_s15 = sshll.u32 %s974_s22, 4  ;;  %s899_s15 = int_to_ptr.vmem [resolvable:$false] %s898_s15 }
  0x70   : > { %v289_v25 = vld [vmem:[#allocation5 + $0x98] sm:$0xff]  ;;  %v419_v26 = vld [vmem:[#allocation7 + $0x80] sm:$0xff]  ;;  %v420_v27 = vld [vmem:[#allocation7 + $0x88] sm:$0xff]  ;;  %v682_v29 = vpack.c.bf16 %v284_v23, %v282_v22  ;;  %s900_s17 = scalar_lea.vmem %s899_s15, 256  ;;  %p901_p5 = scmp.lt.s32.totalorder %s1205_s7, %s899_s15 }
  0x71   : > { %v403_v28 = vld [vmem:[#allocation7] sm:$0xff]  ;;  %v700_v30 = vpack.c.bf16 %v420_v27, %v419_v26  ;;  %v404_v31 = vld [vmem:[#allocation7 + $0x8] sm:$0xff]  ;;  %v684_v32 = vpack.c.bf16 %v289_v25, %v287_v24  ;;  %v288_v34 = vld [vmem:[#allocation5 + $0x90] sm:$0xff]  ;;  %p897_p3 = pneg %p896_p1  ;;  %p902_p9 = scmp.lt.s32.totalorder %s900_s17, %s894_s11 }
  0x72   : > { %675 = vmatpush1.bf16.msra.mxu0 %v674_v14  ;;  %v286_v33 = vld [vmem:[#allocation5 + $0x80] sm:$0xff]  ;;  %v702_v35 = vpack.c.bf16 %v404_v31, %v403_v28  ;;  %v291_v36 = vld [vmem:[#allocation5 + $0xa8] sm:$0xff]  ;;  %v293_v37 = vld [vmem:[#allocation5 + $0xb8] sm:$0xff] }
  0x73   : > { %677 = vmatprep.subr.bf16.mxu0 %v676_v15  ;;  %701 = vmatprep.subr.bf16.mxu1 %v700_v30  ;;  %v686_v38 = vpack.c.bf16 %v288_v34, %v286_v33  ;;  %v688_v39 = vpack.c.bf16 %v293_v37, %v291_v36  ;;  %v290_v40 = vld [vmem:[#allocation5 + $0xa0] sm:$0xff]  ;;  %v292_v41 = vld [vmem:[#allocation5 + $0xb0] sm:$0xff]  ;;  %v295_v42 = vld [vmem:[#allocation5 + $0xc8] sm:$0xff]  ;;  %v304_v34 = vlaneseq  ;;  %p903_p12 = por %p902_p9, %p901_p5 }
  0x74   : > { %703 = vmatpush3.bf16.msra.mxu1 %v702_v35  ;;  %v297_v43 = vld [vmem:[#allocation5 + $0xd8] sm:$0xff]  ;;  %v690_v44 = vpack.c.bf16 %v292_v41, %v290_v40  ;;  %v294_v46 = vld [vmem:[#allocation5 + $0xc0] sm:$0xff]  ;;  %v296_v47 = vld [vmem:[#allocation5 + $0xd0] sm:$0xff] }
  0x75   : > { %v692_v45 = vpack.c.bf16 %v297_v43, %v295_v42  ;;  %v299_v48 = vld [vmem:[#allocation5 + $0xe8] sm:$0xff]  ;;  %v301_v49 = vld [vmem:[#allocation5 + $0xf8] sm:$0xff]  ;;  %v694_v50 = vpack.c.bf16 %v296_v47, %v294_v46  ;;  %v298_v52 = vld [vmem:[#allocation5 + $0xe0] sm:$0xff]  ;;  %v305_v35 = vshrl.u32 %v304_v34, 7  ;;  %p904_p2 = pnand %p903_p12, %p897_p3 }
  0x76   : > { %679 = vmatpush1.bf16.msra.mxu0 %v678_v20  ;;  %v696_v51 = vpack.c.bf16 %v301_v49, %v299_v48  ;;  %v300_v53 = vld [vmem:[#allocation5 + $0xf0] sm:$0xff]  ;;  %v422_v57 = vld [vmem:[#allocation7 + $0x98] sm:$0xff]  ;;  %v423_v62 = vld [vmem:[#allocation7 + $0xa0] sm:$0xff] }
  0x77   : > { %681 = vmatprep.subr.bf16.mxu0 %v680_v21  ;;  %v698_v54 = vpack.c.bf16 %v300_v53, %v298_v52  ;;  %v269_v55 = vld [vmem:[%s1180_s23] sm:$0xff]  ;;  %v424_v63 = vld [vmem:[#allocation7 + $0xa8] sm:$0xff]  ;;  %v407_v1 = vld [vmem:[#allocation7 + $0x20] sm:$0xff]  ;;  %v306_v36 = vsub.s32 0, %v305_v35 }
  0x78   : > { %v421_v56 = vld [vmem:[#allocation7 + $0x90] sm:$0xff]  ;;  %v406_v60 = vld [vmem:[#allocation7 + $0x18] sm:$0xff]  ;;  %v708_v0 = vpack.c.bf16 %v424_v63, %v423_v62  ;;  %v408_v2 = vld [vmem:[#allocation7 + $0x28] sm:$0xff] }
  0x79   : > { %v704_v58 = vpack.c.bf16 %v422_v57, %v421_v56  ;;  %v405_v59 = vld [vmem:[#allocation7 + $0x10] sm:$0xff]  ;;  %v710_v3 = vpack.c.bf16 %v408_v2, %v407_v1  ;;  %v426_v5 = vld [vmem:[#allocation7 + $0xb8] sm:$0xff]  ;;  %v427_v9 = vld [vmem:[#allocation7 + $0xc0] sm:$0xff] }
  0x7a   : > { %683 = vmatpush1.bf16.msra.mxu0 %v682_v29  ;;  %v706_v61 = vpack.c.bf16 %v406_v60, %v405_v59  ;;  %v425_v4 = vld [vmem:[#allocation7 + $0xb0] sm:$0xff]  ;;  %v410_v8 = vld [vmem:[#allocation7 + $0x38] sm:$0xff]  ;;  %v428_v10 = vld [vmem:[#allocation7 + $0xc8] sm:$0xff] }
  0x7b   : > { %685 = vmatprep.subr.bf16.mxu0 %v684_v32  ;;  %705 = vmatprep.subr.bf16.mxu1 %v704_v58  ;;  %v409_v6 = vld [vmem:[#allocation7 + $0x30] sm:$0xff]  ;;  %v712_v7 = vpack.c.bf16 %v426_v5, %v425_v4  ;;  %v716_v12 = vpack.c.bf16 %v428_v10, %v427_v9  ;;  %v411_v13 = vld [vmem:[#allocation7 + $0x40] sm:$0xff]  ;;  %v412_v14 = vld [vmem:[#allocation7 + $0x48] sm:$0xff] }
  0x7c   : > { %707 = vmatpush3.bf16.msra.mxu1 %v706_v61  ;;  %v714_v11 = vpack.c.bf16 %v410_v8, %v409_v6  ;;  %v429_v15 = vld [vmem:[#allocation7 + $0xd0] sm:$0xff]  ;;  %v430_v16 = vld [vmem:[#allocation7 + $0xd8] sm:$0xff]  ;;  %v718_v17 = vpack.c.bf16 %v412_v14, %v411_v13  ;;  %v431_v21 = vld [vmem:[#allocation7 + $0xe0] sm:$0xff] }
  0x7d   : > { %709 = vmatprep.subr.bf16.mxu1 %v708_v0  ;;  %v720_v18 = vpack.c.bf16 %v430_v16, %v429_v15  ;;  %v413_v19 = vld [vmem:[#allocation7 + $0x50] sm:$0xff]  ;;  %v414_v20 = vld [vmem:[#allocation7 + $0x58] sm:$0xff]  ;;  %v432_v22 = vld [vmem:[#allocation7 + $0xe8] sm:$0xff] }
  0x7e   : > { %687 = vmatpush1.bf16.msra.mxu0 %v686_v38  ;;  %v722_v23 = vpack.c.bf16 %v414_v20, %v413_v19  ;;  %v724_v24 = vpack.c.bf16 %v432_v22, %v431_v21  ;;  %v415_v25 = vld [vmem:[#allocation7 + $0x60] sm:$0xff]  ;;  %v416_v26 = vld [vmem:[#allocation7 + $0x68] sm:$0xff]  ;;  %v433_v27 = vld [vmem:[#allocation7 + $0xf0] sm:$0xff]  ;;  %v310_v38 = vsub.s32 1, %v305_v35 }
  0x7f   : > { %689 = vmatprep.subr.bf16.mxu0 %v688_v39  ;;  %v434_v28 = vld [vmem:[#allocation7 + $0xf8] sm:$0xff]  ;;  %v726_v29 = vpack.c.bf16 %v416_v26, %v415_v25  ;;  %v417_v31 = vld [vmem:[#allocation7 + $0x70] sm:$0xff] }
  0x80   : > { %711 = vmatpush3.bf16.msra.mxu1 %v710_v3  ;;  %v728_v30 = vpack.c.bf16 %v434_v28, %v433_v27  ;;  %v418_v32 = vld [vmem:[#allocation7 + $0x78] sm:$0xff]  ;;  %v302_v37 = vld [vmem:[%s1249_s2] sm:$0x3] }
  0x81   : > { %713 = vmatprep.subr.bf16.mxu1 %v712_v7  ;;  %v730_v33 = vpack.c.bf16 %v418_v32, %v417_v31  ;;  %v307_v39 = vrot.slane %v302_v37, %v306_v36  ;;  %v311_v40 = vrot.slane %v302_v37, %v310_v38  ;;  %v628_v0 = vld [vmem:[%s1251_s4] ss:$0 sm:$0xff] }
  0x82   : > { %691 = vmatpush1.bf16.msra.mxu0 %v690_v44 }
  0x83   : > { %693 = vmatprep.subr.bf16.mxu0 %v692_v45 }
  0x84   : > { %715 = vmatpush3.bf16.msra.mxu1 %v714_v11 }
  0x85   : > { %717 = vmatprep.subr.bf16.mxu1 %v716_v12 }
  0x86   : > { %695 = vmatpush1.bf16.msra.mxu0 %v694_v50 }
  0x87   : > { %697 = vmatprep.subr.bf16.mxu0 %v696_v51 }
  0x88   : > { %719 = vmatpush3.bf16.msra.mxu1 %v718_v17 }
  0x89   : > { %721 = vmatprep.subr.bf16.mxu1 %v720_v18 }
  0x8a   : > { %699 = vmatpush1.bf16.msra.mxu0 %v698_v54 }
  0x8c   : > { %723 = vmatpush3.bf16.msra.mxu1 %v722_v23 }
  0x8d   : > { %379 = vmatmul.mubr.f32.vlgmr.msra.gmra.mrb[0].mxu0 %v269_v55  ;;  %725 = vmatprep.subr.bf16.mxu1 %v724_v24 }
  0x90   : > { %727 = vmatpush3.bf16.msra.mxu1 %v726_v29 }
  0x91   : > { %729 = vmatprep.subr.bf16.mxu1 %v728_v30 }
  0x94   : > { %731 = vmatpush3.bf16.msra.mxu1 %v730_v33 }
 0x160   : > { %v380_v41 = vpop.f32.mrb[0].mxu0 }
 0x161   : > { %v381_v42 = vadd.f32 %v380_v41, %v307_v39  ;;  %v382_v43 = vpop.f32.mrb[1].mxu0 }
 0x162   : > { %v383_v44 = vadd.f32 %v382_v43, %v311_v40 }
 0x163   : > { %v387_v45 = vmul.f32 0.044715, %v381_v42  ;;  %v385_v60 = vmul.f32 0.5, %v381_v42 }
 0x164   : > { %v388_v46 = vmul.f32 0.044715, %v383_v44  ;;  %v386_v58 = vmul.f32 0.5, %v383_v44 }
 0x165   : > { %v389_v47 = vmul.f32 %v387_v45, %v381_v42 }
 0x166   : > { %v390_v48 = vmul.f32 %v388_v46, %v383_v44 }
 0x167   : > { %v391_v49 = vmul.f32 %v389_v47, %v381_v42 }
 0x168   : > { %v392_v50 = vmul.f32 %v390_v48, %v383_v44 }
 0x169   : > { %v393_v51 = vadd.f32 %v391_v49, %v381_v42 }
 0x16a   : > { %v394_v52 = vadd.f32 %v392_v50, %v383_v44 }
 0x16b   : > { %v395_v53 = vmul.f32 0.7978846, %v393_v51 }
 0x16c   : > { %v396_v54 = vmul.f32 0.7978846, %v394_v52 }
 0x16d   : > { %804 = vtanh.f32 %v395_v53 }
 0x16e   : > { %806 = vtanh.f32 %v396_v54 }
 0x177   : > { %v805_v55 = vpop.eup %804 }
 0x178   : > { %v807_v56 = vpop.eup %806  ;;  %v399_v57 = vadd.f32 1.0, %v805_v55 }
 0x179   : > { %v400_v59 = vadd.f32 1.0, %v807_v56 }
 0x17a   : > { %v401_v62 = vmul.f32 %v399_v57, %v385_v60 }
 0x17b   : > { %v402_v61 = vmul.f32 %v400_v59, %v386_v58 }
 0x17d   : > { %506 = vmatprep.mubr.f32.mxu1 %v402_v61 }
 0x17e   : > { %507 = vmatmul.mubr.f32.vlgmr.msra.gmra.mrb[0].mxu1 %v401_v62 }
 0x251   : > { %v665_v63 = vpop.f32.mrb[0].mxu1 }
 0x252   : > { %v666_v1 = vpop.f32.mrb[1].mxu1 }
 0x253   : > { %v667_v2 = vadd.f32 %v666_v1, %v665_v63 }
 0x255   : > { %v509_v3 = vadd.f32 %v667_v2, %v628_v0 }
 0x257   : > { %512 = vst [vmem:[%s268_s13] sm:$0xff] %v509_v3 }
 0x258   : > { %907 = shalt.err (!%p904_p2)
}
 0x259   : > { %s908_s14 = scalar_lea.hbm %s1203_s8, 128  ;;  %s912_s26 = scalar_lea.hbm %s1252_s5, 256 }
 0x25a   : > { %p909_p13 = scmp.ne.s32.totalorder %s1203_s8, %s908_s14  ;;  %p913_p4 = scmp.lt.u32.totalorder %s1203_s8, %s1252_s5 }
 0x25b   : > { %p914_p7 = scmp.lt.u32.totalorder %s912_s26, %s908_s14  ;;  %p916_p11 = scmp.lt.u32.totalorder %s908_s14, %s1203_s8 }
 0x25c   : > { %p910_p6 = pnand %p909_p13, %p1266_p0 }
 0x25d   : > { %p915_p8 = por %p914_p7, %p913_p4 }
 0x25e   : > { %p911_p10 = pneg %p910_p6 }
 0x25f   : > { %p917_p1 = por %p916_p11, %p915_p8 }
 0x261   : > { %p918_p3 = pnand %p917_p1, %p911_p10 }
 0x263   : > { %921 = shalt.err (!%p918_p3)
}
 0x264   : > { %742 = dma.vmem_to_hbm [thread:$0]  (%p1266_p0), %s1205_s7, 128, %s1203_s8, %s514_s9  }
 0x265 PF: > { %s539_s12 = sand.u32 1, %s952_s18   ;;  %p1267_p5 = scmp.ne.s32.totalorder %s1257_s25, 0 }
 0x266   : > { %p1268_p9 = scmp.ge.s32.totalorder %s964_s21, 2  ;;  %s540_s13 = scalar_lea.sflag [#allocation4], %s539_s12 }
 0x268   : > { %p756_p12 = pnand %p1268_p9, %p1267_p5 }
 0x26a   : > { %947 = dma.done.wait (!%p756_p12), %s540_s13, 128  }
 0x26b   : > { %949 = vsyncadd (!%p756_p12), %s540_s13, 4294967168  ;;  %p19_p2 = scmp.ge.s32.totalorder %s1115_s16, 4   ;;  %s1269_s18 = smov %s956_s19 }
 0x26c   : > { %s1270_s19 = smov %s960_s20  ;;  %s1271_s20 = smov %s1124_s27 }
 0x26d   : > { %s1272_s21 = smov %s1115_s16  ;;  %21 = sbr.rel (!%p19_p2) target bundleno = 6 (0x6), region = 93 }
 0x274   :  { %545 = vsyncpa [#allocation3], 1 }
 0x275   :  { %547 = vsyncpa [#allocation3 + $0x1], 1 }
 0x276   :  { %548 = vsyncpa [#allocation6], 1 }
 0x277   :  { %549 = vsyncpa [#allocation4], 1 }
 0x278   :  { %551 = vsyncpa [#allocation4 + $0x1], 1 }

</bundles_post_ra>
